<compile_context>
chip_gen: v7x
topology: tpu7x:2x2x1
jax: 0.10.0
libtpu: 0.0.40
codegen_flags: <defaults>
</compile_context>

<pallas_src>
import jax
import jax.numpy as jnp
from jax.experimental import pallas as pl
from jax.experimental.pallas import tpu as pltpu

LANES = 128
SUBLANES = 8


def _round_up(x: int, m: int) -> int:
    return ((x + m - 1) // m) * m


def _chip_traits():
    """Best-effort, Python-side (trace-time) TPU generation detection."""
    kind = ""
    try:
        kind = jax.devices()[0].device_kind.lower()
    except Exception:
        pass
    # Chips where one Pallas kernel can shard a 'parallel' axis over 2 TensorCores.
    two_tc = any(t in kind for t in ("v7", "v4", "v5p"))
    # v5e only has a 16 MiB scoped-VMEM default -> keep tiles a bit smaller.
    is_v5e = ("v5e" in kind) or ("v5 lite" in kind) or ("v5litepod" in kind)
    return two_tc, is_v5e


def _make_mape_kernel(rows, tile_rows, chunk_rows, n_chunks, tiles_per_core, need_mask):
    """Partial-sum kernel: accumulates sum(|(yt - yp) / yt|) into an (8,128) block."""
    groups = chunk_rows // SUBLANES

    def tile_partial(yp_ref, yt_ref, row_start, masked):
        acc = jnp.zeros((SUBLANES, LANES), jnp.float32)
        for c in range(n_chunks):                       # <= 8 static chunks
            r0 = c * chunk_rows                         # static -> aligned loads
            yp = yp_ref[pl.ds(r0, chunk_rows), :].astype(jnp.float32)
            yt = yt_ref[pl.ds(r0, chunk_rows), :].astype(jnp.float32)
            ape = jnp.abs((yt - yp) / yt)
            if masked:
                # Row-level mask only; slab padding is 1-valued so it already
                # contributes 0 (and can't produce NaN).
                rid = jax.lax.broadcasted_iota(jnp.int32, (chunk_rows, LANES), 0)
                ok = (row_start + (r0 + rid)) < rows
                ape = jnp.where(ok, ape, jnp.float32(0.0))
            # Fold into the vreg-shaped accumulator: pure VPU adds, no
            # cross-lane reduction inside the kernel.
            acc = acc + ape.reshape(groups, SUBLANES, LANES).sum(axis=0)
        return acc

    def kernel(yp_ref, yt_ref, out_ref):
        p = pl.program_id(0)   # core split (parallel)
        i = pl.program_id(1)   # reduction tiles (arbitrary)

        @pl.when(i == 0)
        def _():
            out_ref[...] = jnp.zeros_like(out_ref)

        if not need_mask:
            # Perfectly tiled input: no mask code is emitted at all.
            out_ref[...] += tile_partial(yp_ref, yt_ref, 0, masked=False)
        else:
            row_start = (p * tiles_per_core + i) * tile_rows
            is_full = (row_start + tile_rows) <= rows

            @pl.when(is_full)                      # hot path: zero mask math
            def _():
                out_ref[...] += tile_partial(yp_ref, yt_ref, row_start, masked=False)

            @pl.when(jnp.logical_not(is_full))     # ragged / clamped duplicate tile
            def _():
                out_ref[...] += tile_partial(yp_ref, yt_ref, row_start, masked=True)

    return kernel


def mape_loss(y_pred: jax.Array, y_true: jax.Array) -> jax.Array:
    """Pallas implementation of torch MAPELoss.forward: mean(|(y_true-y_pred)/y_true|).

    Like the PyTorch reference, zeros in y_true produce inf/nan.
    """
    y_pred = jnp.asarray(y_pred)
    y_true = jnp.asarray(y_true)
    assert y_pred.shape == y_true.shape, "y_pred / y_true must have the same shape"
    n = y_pred.size
    assert n > 0, "MAPE of an empty tensor is undefined"

    # Flatten (free for contiguous arrays); keep the original dtype so bf16
    # inputs travel at half the HBM bytes.
    yp = y_pred.reshape(-1)
    yt = y_true.reshape(-1)

    rem = n % LANES
    if rem:
        # Pad BOTH inputs with 1 so padded elements contribute exactly 0 and
        # need no in-kernel masking.  Only materialized when n % 128 != 0.
        # TODO(synk): drop even this copy via a flat 1-D (tr*128,) BlockSpec once
        # the flat->(rows,128) in-kernel fold is verified layout-free on Mosaic.
        pad = LANES - rem
        yp = jnp.pad(yp, (0, pad), constant_values=1)
        yt = jnp.pad(yt, (0, pad), constant_values=1)

    rows = (n + LANES - 1) // LANES
    yp2 = yp.reshape(rows, LANES)
    yt2 = yt.reshape(rows, LANES)

    two_tc, is_v5e = _chip_traits()
    ncores = 2 if two_tc else 1

    # Per-input, per-buffer tile target: 2 MiB on v5e (16 MiB scoped-VMEM
    # default), 4 MiB elsewhere.  Double-buffered footprint = 2 inputs x 2 bufs.
    itemsize = max(jnp.dtype(y_pred.dtype).itemsize, jnp.dtype(y_true.dtype).itemsize)
    tile_bytes = (2 if is_v5e else 4) * 1024 * 1024
    target_rows = max(SUBLANES, tile_bytes // (LANES * itemsize))

    if rows <= target_rows:
        tr = _round_up(rows, SUBLANES)
        chunk_rows = tr
    else:
        tr = target_rows                    # power-of-two multiple of 8
        chunk_rows = max(512, tr // 8)      # <= 8 inner chunks, small VMEM temps
    n_chunks = tr // chunk_rows

    total_tiles = pl.cdiv(rows, tr)
    tiles_per_core = pl.cdiv(total_tiles, ncores)
    need_mask = (ncores * tiles_per_core * tr) != rows   # static specialization

    kernel = _make_mape_kernel(rows, tr, chunk_rows, n_chunks, tiles_per_core, need_mask)

    def in_map(p, i):
        # Clamp so a (possible) extra tile slot on the last core never DMAs out
        # of bounds; its contribution is masked to zero inside the kernel.
        return (jnp.minimum(p * tiles_per_core + i, total_tiles - 1), 0)

    bytes_in = n * (jnp.dtype(y_pred.dtype).itemsize + jnp.dtype(y_true.dtype).itemsize)
    partials = pl.pallas_call(
        kernel,
        out_shape=jax.ShapeDtypeStruct((ncores * SUBLANES, LANES), jnp.float32),
        grid=(ncores, tiles_per_core),
        in_specs=[
            pl.BlockSpec((tr, LANES), in_map),
            pl.BlockSpec((tr, LANES), in_map),
        ],
        out_specs=pl.BlockSpec((SUBLANES, LANES), lambda p, i: (p, 0)),
        compiler_params=pltpu.CompilerParams(
            # TODO(synk): verify the leading axis actually shards across both
            # TensorCores on v7x; switch to pltpu.CORE_PARALLEL if it does not.
            dimension_semantics=("parallel", "arbitrary"),
        ),
        cost_estimate=pl.CostEstimate(
            flops=4 * n,
            transcendentals=0,
            bytes_accessed=bytes_in + ncores * SUBLANES * LANES * 4,
        ),
    )(yp2, yt2)

    # Single cheap cross-lane reduce of the (ncores x 8 x 128) partial sums + mean.
    out_dtype = jnp.promote_types(jnp.result_type(y_pred.dtype, y_true.dtype), jnp.float32)
    return (jnp.sum(partials) / jnp.float32(n)).astype(out_dtype)


if __name__ == "__main__":
    key = jax.random.PRNGKey(0)
    k1, k2 = jax.random.split(key)

    # Small NCHW-like shape, matching a typical regression-output use of MAPELoss.
    shape = (2, 4, 16, 16)
    y_pred = jax.random.normal(k1, shape, dtype=jnp.float32)
    # Keep y_true away from zero (MAPE divides by y_true).
    y_true = jax.random.uniform(k2, shape, dtype=jnp.float32, minval=0.5, maxval=2.0)

    result = mape_loss(y_pred, y_true)
    result = jax.block_until_ready(result)

    # Reference check in plain JAX.
    ref = jnp.mean(jnp.abs((y_true - y_pred) / y_true))
    assert jnp.allclose(result, ref, rtol=1e-5, atol=1e-6), (result, ref)

    print("KERNEL_OK")
</pallas_src>

<mosaic_0001>
module attributes {stable_mosaic.version = 11 : i64} {
  func.func @kernel(%arg0: i32, %arg1: i32, %arg2: memref<16x128xf32, #tpu.memory_space<vmem>>, %arg3: memref<16x128xf32, #tpu.memory_space<vmem>>, %arg4: memref<8x128xf32, #tpu.memory_space<vmem>>) attributes {dimension_semantics = [#tpu.dimension_semantics<parallel>, #tpu.dimension_semantics<arbitrary>], iteration_bounds = array<i64: 1, 1>, scalar_prefetch = 0 : i64, scratch_operands = 0 : i64, tpu.core_type = #tpu.core_type<tc>, window_params = [{transform_indices = @transform_0, window_bounds = array<i64: 16, 128>}, {transform_indices = @transform_1, window_bounds = array<i64: 16, 128>}, {transform_indices = @transform_2, window_bounds = array<i64: 8, 128>}]} {
    %c0_i32 = arith.constant 0 : i32
    %0 = arith.cmpi eq, %arg1, %c0_i32 : i32
    %1 = arith.extui %0 : i1 to i32
    %c0_i32_0 = arith.constant 0 : i32
    %2 = arith.cmpi ne, %1, %c0_i32_0 : i32
    scf.if %2 {
      %cst_9 = arith.constant 0.000000e+00 : f32
      %15 = vector.broadcast %cst_9 : f32 to vector<8x128xf32>
      %c0_10 = arith.constant 0 : index
      %c0_11 = arith.constant 0 : index
      %16 = vector.load %arg4[%c0_10, %c0_11] : memref<8x128xf32, #tpu.memory_space<vmem>>, vector<8x128xf32>
      tpu.vector_store %arg4[%c0_10, %c0_11], %15 {strides = array<i32>} : memref<8x128xf32, #tpu.memory_space<vmem>>, vector<8x128xf32>,
    } else {
    }
    %c0 = arith.constant 0 : index
    %c0_1 = arith.constant 0 : index
    %3 = vector.load %arg4[%c0, %c0_1] : memref<8x128xf32, #tpu.memory_space<vmem>>, vector<8x128xf32>
    %cst = arith.constant 0.000000e+00 : f32
    %4 = vector.broadcast %cst : f32 to vector<8x128xf32>
    %c0_2 = arith.constant 0 : index
    %c0_3 = arith.constant 0 : index
    %5 = vector.load %arg2[%c0_2, %c0_3] : memref<16x128xf32, #tpu.memory_space<vmem>>, vector<16x128xf32>
    %c0_4 = arith.constant 0 : index
    %c0_5 = arith.constant 0 : index
    %6 = vector.load %arg3[%c0_4, %c0_5] : memref<16x128xf32, #tpu.memory_space<vmem>>, vector<16x128xf32>
    %7 = arith.subf %6, %5 : vector<16x128xf32>
    %8 = arith.divf %7, %6 : vector<16x128xf32>
    %9 = math.absf %8 : vector<16x128xf32>
    %10 = vector.shape_cast %9 : vector<16x128xf32> to vector<2x8x128xf32>
    %cst_6 = arith.constant dense<0.000000e+00> : vector<8x128xf32>
    %11 = vector.multi_reduction <add>, %10, %cst_6 [0] : vector<2x8x128xf32> to vector<8x128xf32>
    %12 = arith.addf %4, %11 : vector<8x128xf32>
    %13 = arith.addf %3, %12 : vector<8x128xf32>
    %c0_7 = arith.constant 0 : index
    %c0_8 = arith.constant 0 : index
    %14 = vector.load %arg4[%c0_7, %c0_8] : memref<8x128xf32, #tpu.memory_space<vmem>>, vector<8x128xf32>
    tpu.vector_store %arg4[%c0_7, %c0_8], %13 {strides = array<i32>} : memref<8x128xf32, #tpu.memory_space<vmem>>, vector<8x128xf32>,
    return
  }
  func.func @transform_0(%arg0: i32, %arg1: i32) -> (i32, i32) {
    %c1_i32 = arith.constant 1 : i32
    %0 = arith.muli %arg0, %c1_i32 : i32
    %1 = arith.addi %0, %arg1 : i32
    %c0_i32 = arith.constant 0 : i32
    %2 = arith.minsi %1, %c0_i32 : i32
    %c0_i32_0 = arith.constant 0 : i32
    %c0_i32_1 = arith.constant 0 : i32
    return %2, %c0_i32_0 : i32, i32
  }
  func.func @transform_1(%arg0: i32, %arg1: i32) -> (i32, i32) {
    %c1_i32 = arith.constant 1 : i32
    %0 = arith.muli %arg0, %c1_i32 : i32
    %1 = arith.addi %0, %arg1 : i32
    %c0_i32 = arith.constant 0 : i32
    %2 = arith.minsi %1, %c0_i32 : i32
    %c0_i32_0 = arith.constant 0 : i32
    %c0_i32_1 = arith.constant 0 : i32
    return %2, %c0_i32_0 : i32, i32
  }
  func.func @transform_2(%arg0: i32, %arg1: i32) -> (i32, i32) {
    %c0_i32 = arith.constant 0 : i32
    %c0_i32_0 = arith.constant 0 : i32
    return %arg0, %c0_i32 : i32, i32
  }
}

</mosaic_0001>

<bundles_post_ra>
// kernel: tpu_custom_call.1
= control target key start
LH: loop header
LB: loop body
LE: loop exit
PB: predicated region body
PF: predicated region fallthrough
CT: control target
= control target key end

     0   :  { %7 = vsyncpa [#allocation3], 0  ;;  %s240_s0 = inlined_call_operand.hbm [shape: f32[16,128], index: 0, kind: input, shape index: {}]   ;;  %s241_s1 = inlined_call_operand.hbm [shape: f32[16,128], index: 1, kind: input, shape index: {}]   ;;  %s242_s2 = inlined_call_operand.hbm [shape: f32[8,128], index: 2, kind: output, shape index: {}]  }
   0x1   :  { %8 = vsyncpa [#allocation6], 0 }
   0x2   :  { %9 = vsyncpa [#allocation4], 0  ;;  %s184_s9 = smov [#allocation2]   ;;  %s112_s13 = scalar_lea.hbm %s240_s0, 256 }
   0x3   :  { %s21_s10 = sshll.u32 %s184_s9, 4  ;;  %p113_p0 = scmp.ne.s32.totalorder %s240_s0, %s112_s13  ;;  %s22_s10 = int_to_ptr.vmem [resolvable:$true] %s21_s10 }
   0x4   :  { %p116_p1 = scmp.lt.u32.totalorder %s112_s13, %s240_s0 }
   0x6   :  { %p118_p2 = pnand %p116_p1, %p113_p0 }
   0x8   :  { %121 = shalt.err (!%p118_p2)
}
   0x9   :  { %s122_s18 = scalar_lea.vmem %s22_s10, 256  ;;  %p127_p4 = scmp.lt.s32.totalorder %s22_s10, %s22_s10 }
   0xa   :  { %p123_p3 = scmp.ne.s32.totalorder %s22_s10, %s122_s18  ;;  %p128_p5 = scmp.lt.s32.totalorder %s122_s18, %s122_s18 }
   0xc   :  { %p129_p6 = por %p128_p5, %p127_p4 }
   0xe   :  { %p130_p7 = pnand %p129_p6, %p123_p3 }
  0x10   :  { %133 = shalt.err (!%p130_p7)
}
  0x11   :  { %s185_s19 = smov 128   ;;  %s186_s20 = smov 8  }
  0x12   :  { %27 = dma.hbm_to_vmem [thread:$0]  %s240_s0, 256, %s22_s10, [#allocation3], %s185_s19, %s185_s19, %s186_s20  }
  0x13   :  { %s187_s23 = smov [#allocation5]   ;;  %s134_s27 = scalar_lea.hbm %s241_s1, 256 }
  0x14   :  { %s39_s24 = sshll.u32 %s187_s23, 4  ;;  %p135_p8 = scmp.ne.s32.totalorder %s241_s1, %s134_s27  ;;  %s40_s24 = int_to_ptr.vmem [resolvable:$true] %s39_s24 }
  0x15   :  { %p138_p9 = scmp.lt.u32.totalorder %s134_s27, %s241_s1 }
  0x17   :  { %p140_p10 = pnand %p138_p9, %p135_p8 }
  0x19   :  { %143 = shalt.err (!%p140_p10)
}
  0x1a   :  { %s144_s4 = scalar_lea.vmem %s40_s24, 256  ;;  %p149_p12 = scmp.lt.s32.totalorder %s40_s24, %s40_s24 }
  0x1b   :  { %p145_p11 = scmp.ne.s32.totalorder %s40_s24, %s144_s4  ;;  %p150_p13 = scmp.lt.s32.totalorder %s144_s4, %s144_s4 }
  0x1d   :  { %p151_p0 = por %p150_p13, %p149_p12 }
  0x1f   :  { %p152_p1 = pnand %p151_p0, %p145_p11 }
  0x21   :  { %155 = shalt.err (!%p152_p1)
}
  0x22   :  { %45 = dma.hbm_to_vmem [thread:$0]  %s241_s1, 256, %s40_s24, [#allocation6], %s185_s19, %s185_s19, %s186_s20  }
  0x23   :  { %178 = dma.done.wait [#allocation3], 256  }
  0x24   :  { %179 = vsyncadd [#allocation3], 4294967040 }
  0x25   :  { %180 = dma.done.wait [#allocation6], 256  }
  0x26   :  { %181 = vsyncadd [#allocation6], 4294967040  ;;  %v68_v0 = vld [vmem:[#allocation5] sm:$0xff]  ;;  %v69_v1 = vld [vmem:[#allocation5 + $0x8] sm:$0xff]  ;;  %s188_s6 = smov [#allocation7]  }
  0x27   :  { %108 = vrcp.f32 %v68_v0  ;;  %v66_v2 = vld [vmem:[#allocation2] sm:$0xff]  ;;  %v67_v3 = vld [vmem:[#allocation2 + $0x8] sm:$0xff]  ;;  %s88_s1 = sshll.u32 %s188_s6, 4  ;;  %s89_s1 = int_to_ptr.vmem [resolvable:$true] %s88_s1 }
  0x28   :  { %110 = vrcp.f32 %v69_v1  ;;  %v70_v4 = vsub.f32 %v68_v0, %v66_v2  ;;  %v71_v5 = vsub.f32 %v69_v1, %v67_v3  ;;  %s156_s7 = scalar_lea.vmem %s89_s1, 128  ;;  %p161_p3 = scmp.lt.s32.totalorder %s89_s1, %s89_s1 }
  0x29   :  { %p157_p2 = scmp.ne.s32.totalorder %s89_s1, %s156_s7  ;;  %p162_p4 = scmp.lt.s32.totalorder %s156_s7, %s156_s7 }
  0x2b   :  { %p163_p5 = por %p162_p4, %p161_p3 }
  0x2d   :  { %p164_p6 = pnand %p163_p5, %p157_p2 }
  0x31   :  { %v109_v6 = vpop.eup %108 }
  0x32   :  { %v111_v7 = vpop.eup %110  ;;  %v73_v8 = vmul.f32 %v109_v6, %v70_v4 }
  0x33   :  { %v75_v9 = vmul.f32 %v111_v7, %v71_v5 }
  0x34   :  { %v76_v10 = vand.u32 2147483647, %v73_v8 }
  0x35   :  { %v77_v11 = vand.u32 2147483647, %v75_v9 }
  0x37   :  { %v78_v12 = vadd.f32 %v77_v11, %v76_v10 }
  0x39   :  { %81 = vst [vmem:[#allocation7] sm:$0xff] %v78_v12 }
  0x3a   :  { %167 = shalt.err (!%p164_p6)
}
  0x3b   :  { %s168_s10 = scalar_lea.hbm %s242_s2, 128 }
  0x3c   :  { %p169_p7 = scmp.ne.s32.totalorder %s242_s2, %s168_s10  ;;  %p172_p8 = scmp.lt.u32.totalorder %s168_s10, %s242_s2 }
  0x3e   :  { %p174_p9 = pnand %p172_p8, %p169_p7 }
  0x40   :  { %177 = shalt.err (!%p174_p9)
}
  0x41   :  { %91 = dma.vmem_to_hbm [thread:$0]  %s89_s1, 128, %s242_s2, [#allocation4]  }
  0x42   :  { %182 = dma.done.wait [#allocation4], 128  }
  0x43   :  { %183 = vsyncadd [#allocation4], 4294967168 }
  0x44   :  { %95 = vsyncpa [#allocation3], 1 }
  0x45   :  { %96 = vsyncpa [#allocation6], 1 }
  0x46   :  { %97 = vsyncpa [#allocation4], 1 }

</bundles_post_ra>
